<compile_context>
chip_gen: v7x
topology: tpu7x:2x2x1
jax: 0.10.0
libtpu: 0.0.40
codegen_flags: <defaults>
</compile_context>

<pallas_src>
import functools
import math

import jax
import jax.numpy as jnp
from jax.experimental import pallas as pl
from jax.experimental.pallas import tpu as pltpu

NEG_SLOPE = 0.2


def _round_up(v, m):
    return ((v + m - 1) // m) * m


def _cdiv(a, b):
    return -(-a // b)


def _largest_tile(dim_pad, cap, unit=128):
    """Largest multiple of `unit` that divides dim_pad and is <= cap."""
    q = dim_pad // unit
    best, d = 1, 1
    while d * d <= q:
        if q % d == 0:
            for cand in (d, q // d):
                if cand * unit <= cap and cand > best:
                    best = cand
        d += 1
    return best * unit


def _device_tiling_config(use_bf16_mxu):
    """(tile_cap, vmem_limit_bytes, two_tensorcores) for the current TPU gen."""
    try:
        kind = jax.devices()[0].device_kind.lower()
    except Exception:
        kind = ""
    is_v7 = ("v7" in kind) or ("7x" in kind)
    older = any(t in kind for t in ("v4", "v5", "v6")) and not is_v7
    if older:
        # v4/v5e/v6e: 128 MiB physical VMEM, one TensorCore per chip.
        return 1024, 64 * 1024 * 1024, False
    # v7x (or unknown device): 64 MiB VMEM per TensorCore, 2 TCs per chip.
    cap = 1024 if use_bf16_mxu else 768
    return cap, 40 * 1024 * 1024, True


# ---------------------------------------------------------------------------
# Kernels
# ---------------------------------------------------------------------------

def _leaky_relu(y):
    # leaky_relu(0.2): max(y, 0.2*y) == where(y > 0, y, 0.2*y) for slope < 1
    return jnp.maximum(y, NEG_SLOPE * y)


def _mlp_small_kernel(x_ref, w_ref, b_ref, o_ref):
    """Whole problem in one block: dot + bias + leaky_relu, one lane-dense store."""
    y = jnp.dot(x_ref[...], w_ref[...], preferred_element_type=jnp.float32)
    o_ref[...] = _leaky_relu(y + b_ref[...]).astype(o_ref.dtype)


def _mlp_kernel_f32out(x_ref, w_ref, b_ref, o_ref):
    """Tiled kernel, f32 output: accumulate directly into the resident o_ref."""
    k = pl.program_id(2)
    part = jnp.dot(x_ref[...], w_ref[...], preferred_element_type=jnp.float32)

    @pl.when(k == 0)
    def _():
        o_ref[...] = part            # init with the first dot (no zero round-trip)

    @pl.when(k > 0)
    def _():
        o_ref[...] += part

    @pl.when(k == pl.num_programs(2) - 1)
    def _():
        o_ref[...] = _leaky_relu(o_ref[...] + b_ref[...])


def _mlp_kernel_acc(x_ref, w_ref, b_ref, o_ref, acc_ref):
    """Tiled kernel, non-f32 output: f32 VMEM accumulator + cast epilogue."""
    k = pl.program_id(2)
    part = jnp.dot(x_ref[...], w_ref[...], preferred_element_type=jnp.float32)

    @pl.when(k == 0)
    def _():
        acc_ref[...] = part

    @pl.when(k > 0)
    def _():
        acc_ref[...] += part

    @pl.when(k == pl.num_programs(2) - 1)
    def _():
        o_ref[...] = _leaky_relu(acc_ref[...] + b_ref[...]).astype(o_ref.dtype)


# ---------------------------------------------------------------------------
# Wrapper
# ---------------------------------------------------------------------------

def prepare_mlp_params(w_t, b, *, use_bf16_mxu=True):
    """Pad (and optionally bf16-cast) weight/bias ONCE, outside the forward.

    w_t: (K, N) weight pre-transposed from torch's (N, K); b: (1, N) bias.
    Returns w_p: (K_pad, N_pad) in bf16 (or f32), b_p: (1, N_pad) f32.
    """
    K, N = w_t.shape
    K_pad, N_pad = _round_up(K, 128), _round_up(N, 128)
    w_p = w_t
    if (K_pad, N_pad) != (K, N):
        w_p = jnp.pad(w_t, ((0, K_pad - K), (0, N_pad - N)))
    if use_bf16_mxu:
        w_p = w_p.astype(jnp.bfloat16)
    b_p = b.astype(jnp.float32)
    if N_pad != N:
        b_p = jnp.pad(b_p, ((0, 0), (0, N_pad - N)))
    return w_p, b_p


@functools.partial(
    jax.jit, static_argnames=("out_features", "_force_tiled", "_test_tile_cap"))
def mlp_layer_forward(x, w_p, b_p, *, out_features,
                      _force_tiled=False, _test_tile_cap=None):
    """leaky_relu(x @ W + b, 0.2); W/b must come from prepare_mlp_params."""
    M, K = x.shape
    K_pad, N_pad = w_p.shape
    assert K_pad == _round_up(K, 128), "w_p must come from prepare_mlp_params"
    assert b_p.shape == (1, N_pad)
    assert out_features <= N_pad

    out_dtype = x.dtype
    mxu_dtype = w_p.dtype                    # bf16 MXU path iff weights are bf16
    use_bf16 = (mxu_dtype == jnp.bfloat16)
    row_align = 16 if use_bf16 else 8        # bf16 packs two rows per sublane

    cap, vmem_limit, two_cores = _device_tiling_config(use_bf16)
    if _test_tile_cap is not None:
        cap = _test_tile_cap

    itemsize = jnp.dtype(mxu_dtype).itemsize

    # ---- small-problem fast path check --------------------------------------
    M_al = _round_up(M, row_align)
    small_bytes = (M_al * K_pad * itemsize + K_pad * N_pad * itemsize
                   + M_al * N_pad * 4 + N_pad * 4)
    use_small = (not _force_tiled and M_al <= cap and N_pad <= cap
                 and K_pad <= cap and small_bytes <= 4 * 1024 * 1024)

    # ---- tile plan -----------------------------------------------------------
    if use_small:
        tm, mb = M_al, 1
        tn, nb = N_pad, 1
        tk, kb = K_pad, 1
    else:
        mb = _cdiv(M, cap)
        tm = _round_up(_cdiv(M, mb), row_align)      # balanced M tiles
        tk = _largest_tile(K_pad, cap)
        tn = _largest_tile(N_pad, cap)
        kb, nb = K_pad // tk, N_pad // tn
        if two_cores and mb == 1 and nb == 1:
            # keep both v7x TensorCores busy: force >=2 blocks on a parallel axis
            if N_pad >= 256:
                tn = _largest_tile(N_pad, N_pad // 2)
                nb = N_pad // tn
            elif M >= 2 * row_align:
                mb = 2
                tm = _round_up(_cdiv(M, mb), row_align)
    M_pad = tm * mb

    # ---- pad/cast the activations only (weights/bias already prepared) ------
    x_p = x.astype(mxu_dtype) if x.dtype != mxu_dtype else x
    if M_pad != M or K_pad != K:
        x_p = jnp.pad(x_p, ((0, M_pad - M), (0, K_pad - K)))

    if use_small:
        out = pl.pallas_call(
            _mlp_small_kernel,
            out_shape=jax.ShapeDtypeStruct((M_pad, N_pad), out_dtype),
            grid=(1,),
            in_specs=[
                pl.BlockSpec((M_pad, K_pad), lambda i: (0, 0)),
                pl.BlockSpec((K_pad, N_pad), lambda i: (0, 0)),
                pl.BlockSpec((1, N_pad), lambda i: (0, 0)),
            ],
            out_specs=pl.BlockSpec((M_pad, N_pad), lambda i: (0, 0)),
        )(x_p, w_p, b_p)
        return out[:M, :out_features]

    grid = (mb, nb, kb)
    cost = pl.CostEstimate(
        flops=2 * M_pad * K_pad * N_pad,
        transcendentals=0,
        bytes_accessed=(
            M_pad * K_pad * itemsize * nb          # x re-read per N block
            + K_pad * N_pad * itemsize * mb        # W re-read per M block
            + N_pad * 4 * mb                       # bias
            + M_pad * N_pad * jnp.dtype(out_dtype).itemsize
        ),
    )
    in_specs = [
        pl.BlockSpec((tm, tk), lambda i, j, k: (i, k)),   # x tile
        pl.BlockSpec((tk, tn), lambda i, j, k: (k, j)),   # weight tile
        pl.BlockSpec((1, tn), lambda i, j, k: (0, j)),    # bias tile
    ]
    out_spec = pl.BlockSpec((tm, tn), lambda i, j, k: (i, j))
    compiler_params = pltpu.CompilerParams(
        dimension_semantics=("parallel", "parallel", "arbitrary"),
        vmem_limit_bytes=vmem_limit,
    )

    if out_dtype == jnp.float32:
        # f32 output: accumulate straight into the resident output block.
        out = pl.pallas_call(
            _mlp_kernel_f32out,
            out_shape=jax.ShapeDtypeStruct((M_pad, N_pad), out_dtype),
            grid_spec=pltpu.PrefetchScalarGridSpec(
                num_scalar_prefetch=0, grid=grid,
                in_specs=in_specs, out_specs=out_spec),
            compiler_params=compiler_params,
            cost_estimate=cost,
        )(x_p, w_p, b_p)
    else:
        out = pl.pallas_call(
            _mlp_kernel_acc,
            out_shape=jax.ShapeDtypeStruct((M_pad, N_pad), out_dtype),
            grid_spec=pltpu.PrefetchScalarGridSpec(
                num_scalar_prefetch=0, grid=grid,
                in_specs=in_specs, out_specs=out_spec,
                scratch_shapes=[pltpu.VMEM((tm, tn), jnp.float32)]),
            compiler_params=compiler_params,
            cost_estimate=cost,
        )(x_p, w_p, b_p)

    return out[:M, :out_features]


def init_mlp_params(key, in_features, out_features, *, is_first=False, bias=True,
                    dtype=jnp.float32):
    """Deterministic param init matching MLPLayer.init_weights semantics."""
    k_w, k_b = jax.random.split(key)
    if is_first:
        bound = 1.0 / in_features
    else:
        # xavier_uniform with gain = calculate_gain('leaky_relu', 0.2)
        gain = math.sqrt(2.0 / (1.0 + 0.2 ** 2))
        bound = gain * math.sqrt(6.0 / (in_features + out_features))
    w = jax.random.uniform(k_w, (out_features, in_features), dtype,
                           minval=-bound, maxval=bound)
    if bias:
        b_bound = 1.0 / math.sqrt(in_features)
        b = jax.random.uniform(k_b, (1, out_features), dtype,
                               minval=-b_bound, maxval=b_bound)
    else:
        b = jnp.zeros((1, out_features), dtype)
    # Pre-transpose weight to (in, out) for the kernel's matmul layout.
    return w.T, b


if __name__ == "__main__":
    key = jax.random.PRNGKey(0)
    k_x, k_p, k_x2, k_p2 = jax.random.split(key, 4)
    HIGH = jax.lax.Precision.HIGHEST

    # ---- test 1: default path (bf16 MXU inputs, small-problem fast path) ----
    batch, in_f, out_f = 200, 64, 48          # batch not a multiple of 8/128
    x = jax.random.normal(k_x, (batch, in_f), jnp.float32)
    w_t, b = init_mlp_params(k_p, in_f, out_f, is_first=False, bias=True)
    w_p, b_p = prepare_mlp_params(w_t, b, use_bf16_mxu=True)

    out = mlp_layer_forward(x, w_p, b_p, out_features=out_f)
    jax.block_until_ready(out)

    xb = x.astype(jnp.bfloat16).astype(jnp.float32)
    wb = w_t.astype(jnp.bfloat16).astype(jnp.float32)
    ref = jnp.dot(xb, wb, precision=HIGH) + b
    ref = jnp.maximum(ref, 0.2 * ref)
    assert out.shape == (batch, out_f)
    assert jnp.allclose(out, ref, atol=1e-2, rtol=1e-2)

    # ---- test 2: tiled path (forced tiny tiles), f32 MXU inputs, f32 out ----
    M2, K2, N2 = 200, 256, 384
    x2 = jax.random.normal(k_x2, (M2, K2), jnp.float32)
    w_t2, b2 = init_mlp_params(k_p2, K2, N2, is_first=False, bias=True)
    w_p2, b_p2 = prepare_mlp_params(w_t2, b2, use_bf16_mxu=False)

    out2 = mlp_layer_forward(x2, w_p2, b_p2, out_features=N2,
                             _force_tiled=True, _test_tile_cap=128)
    jax.block_until_ready(out2)
    ref2 = jnp.dot(x2, w_t2, precision=HIGH) + b2
    ref2 = jnp.maximum(ref2, 0.2 * ref2)
    assert out2.shape == (M2, N2)
    assert jnp.allclose(out2, ref2, atol=1e-2, rtol=1e-2)

    # ---- test 3: tiled path, bf16 activations -> bf16 out (scratch acc) -----
    x3 = x2.astype(jnp.bfloat16)
    w_p3, b_p3 = prepare_mlp_params(w_t2, b2, use_bf16_mxu=True)
    out3 = mlp_layer_forward(x3, w_p3, b_p3, out_features=N2,
                             _force_tiled=True, _test_tile_cap=128)
    jax.block_until_ready(out3)
    ref3 = jnp.dot(x3.astype(jnp.float32),
                   w_t2.astype(jnp.bfloat16).astype(jnp.float32),
                   precision=HIGH) + b2
    ref3 = jnp.maximum(ref3, 0.2 * ref3)
    assert out3.dtype == jnp.bfloat16
    assert jnp.allclose(out3.astype(jnp.float32), ref3, atol=5e-2, rtol=5e-2)

    print("KERNEL_OK")
</pallas_src>

<mosaic_0001>
module attributes {stable_mosaic.version = 11 : i64} {
  func.func @_mlp_small_kernel(%arg0: i32, %arg1: memref<208x128xbf16, #tpu.memory_space<vmem>>, %arg2: memref<128x128xbf16, #tpu.memory_space<vmem>>, %arg3: memref<1x128xf32, #tpu.memory_space<vmem>>, %arg4: memref<208x128xf32, #tpu.memory_space<vmem>>) attributes {dimension_semantics = [#tpu.dimension_semantics<arbitrary>], iteration_bounds = array<i64: 1>, scalar_prefetch = 0 : i64, scratch_operands = 0 : i64, tpu.core_type = #tpu.core_type<tc>, window_params = [{pipeline_mode = #tpu.pipeline_mode<synchronous>, transform_indices = @transform_0, window_bounds = array<i64: 208, 128>}, {pipeline_mode = #tpu.pipeline_mode<synchronous>, transform_indices = @transform_1, window_bounds = array<i64: 128, 128>}, {pipeline_mode = #tpu.pipeline_mode<synchronous>, transform_indices = @transform_2, window_bounds = array<i64: 1, 128>}, {pipeline_mode = #tpu.pipeline_mode<synchronous>, transform_indices = @transform_3, window_bounds = array<i64: 208, 128>}]} {
    %c0 = arith.constant 0 : index
    %c0_0 = arith.constant 0 : index
    %0 = vector.load %arg1[%c0, %c0_0] : memref<208x128xbf16, #tpu.memory_space<vmem>>, vector<208x128xbf16>
    %c0_1 = arith.constant 0 : index
    %c0_2 = arith.constant 0 : index
    %1 = vector.load %arg2[%c0_1, %c0_2] : memref<128x128xbf16, #tpu.memory_space<vmem>>, vector<128x128xbf16>
    %cst = arith.constant dense<0.000000e+00> : vector<208x128xf32>
    %2 = tpu.matmul %0, %1, %cst {dimension_numbers = #tpu.dot_dimension_numbers<[1], [0], [0], [1], [0, 0, 1, 1], [], []>} : vector<208x128xbf16>, vector<128x128xbf16>, vector<208x128xf32> -> vector<208x128xf32>
    %c0_3 = arith.constant 0 : index
    %c0_4 = arith.constant 0 : index
    %3 = vector.load %arg3[%c0_3, %c0_4] : memref<1x128xf32, #tpu.memory_space<vmem>>, vector<1x128xf32>
    %4 = vector.broadcast %3 : vector<1x128xf32> to vector<208x128xf32>
    %5 = arith.addf %2, %4 : vector<208x128xf32>
    %cst_5 = arith.constant 2.000000e-01 : f32
    %6 = vector.broadcast %cst_5 : f32 to vector<208x128xf32>
    %7 = arith.mulf %6, %5 : vector<208x128xf32>
    %8 = arith.maximumf %5, %7 : vector<208x128xf32>
    %c0_6 = arith.constant 0 : index
    %c0_7 = arith.constant 0 : index
    %9 = vector.load %arg4[%c0_6, %c0_7] : memref<208x128xf32, #tpu.memory_space<vmem>>, vector<208x128xf32>
    tpu.vector_store %arg4[%c0_6, %c0_7], %8 {strides = array<i32>} : memref<208x128xf32, #tpu.memory_space<vmem>>, vector<208x128xf32>,
    return
  }
  func.func @transform_0(%arg0: i32) -> (i32, i32) {
    %c0_i32 = arith.constant 0 : i32
    %c0_i32_0 = arith.constant 0 : i32
    %c0_i32_1 = arith.constant 0 : i32
    return %c0_i32, %c0_i32_0 : i32, i32
  }
  func.func @transform_1(%arg0: i32) -> (i32, i32) {
    %c0_i32 = arith.constant 0 : i32
    %c0_i32_0 = arith.constant 0 : i32
    %c0_i32_1 = arith.constant 0 : i32
    return %c0_i32, %c0_i32_0 : i32, i32
  }
  func.func @transform_2(%arg0: i32) -> (i32, i32) {
    %c0_i32 = arith.constant 0 : i32
    %c0_i32_0 = arith.constant 0 : i32
    %c0_i32_1 = arith.constant 0 : i32
    return %c0_i32, %c0_i32_0 : i32, i32
  }
  func.func @transform_3(%arg0: i32) -> (i32, i32) {
    %c0_i32 = arith.constant 0 : i32
    %c0_i32_0 = arith.constant 0 : i32
    %c0_i32_1 = arith.constant 0 : i32
    return %c0_i32, %c0_i32_0 : i32, i32
  }
}

</mosaic_0001>

<bundles_post_ra>
// kernel: mlp_layer_forward.1
= control target key start
LH: loop header
LB: loop body
LE: loop exit
PB: predicated region body
PF: predicated region fallthrough
CT: control target
= control target key end

     0   :  { %v559_v0 = vmov 0.0   ;;  %vm560_vm0 = vmmov 0   ;;  %s795_s1 = inlined_call_operand.vmem [shape: bf16[128,128], index: 1, kind: input, shape index: {}]   ;;  %s796_s0 = inlined_call_operand.vmem [shape: bf16[208,128], index: 0, kind: input, shape index: {}]   ;;  %s797_s2 = inlined_call_operand.vmem [shape: f32[1,128], index: 2, kind: input, shape index: {}]   ;;  %s798_s3 = inlined_call_operand.vmem [shape: f32[208,128], index: 3, kind: output, shape index: {}]  }
   0x1   :  { %452 = vmatprep.subr.bf16.mxu0 %v559_v0  ;;  %v538_v1 = vld [vmem:[%s795_s1] sm:$0xff]   ;;  %520 = vmatprep.subr.bf16.mxu1 %v559_v0  ;;  %v539_v2 = vld [vmem:[%s795_s1 + $0x8] sm:$0xff]   ;;  %v540_v3 = vld [vmem:[%s795_s1 + $0x10] sm:$0xff]  }
   0x2   :  { %468 = vmatprep.mubr.msk.bf16.mxu0 %vm560_vm0, %v559_v0  ;;  %496 = vmatprep.mubr.msk.bf16.mxu1 %vm560_vm0, %v559_v0  ;;  %v541_v4 = vld [vmem:[%s795_s1 + $0x18] sm:$0xff]   ;;  %v542_v5 = vld [vmem:[%s795_s1 + $0x20] sm:$0xff]   ;;  %v543_v6 = vld [vmem:[%s795_s1 + $0x28] sm:$0xff]  }
   0x3   :  { %453 = vmatpush3.bf16.msra.mxu0 %v538_v1  ;;  %528 = vmatpush3.bf16.msra.mxu1 %v538_v1  ;;  %v544_v7 = vld [vmem:[%s795_s1 + $0x30] sm:$0xff]   ;;  %v545_v8 = vld [vmem:[%s795_s1 + $0x38] sm:$0xff]   ;;  %v546_v9 = vld [vmem:[%s796_s0] sm:$0xff]  }
   0x4   :  { %454 = vmatprep.subr.bf16.mxu0 %v559_v0  ;;  %521 = vmatprep.subr.bf16.mxu1 %v559_v0  ;;  %v547_v10 = vld [vmem:[%s796_s0 + $0x38] sm:$0xff]   ;;  %v548_v11 = vld [vmem:[%s796_s0 + $0x8] sm:$0xff]   ;;  %v549_v12 = vld [vmem:[%s796_s0 + $0x40] sm:$0xff]  }
   0x5   :  { %v550_v13 = vld [vmem:[%s796_s0 + $0x10] sm:$0xff]   ;;  %v551_v14 = vld [vmem:[%s796_s0 + $0x48] sm:$0xff]   ;;  %v552_v15 = vld [vmem:[%s796_s0 + $0x18] sm:$0xff]  }
   0x6   :  { %v553_v16 = vld [vmem:[%s796_s0 + $0x50] sm:$0xff]   ;;  %v554_v17 = vld [vmem:[%s796_s0 + $0x20] sm:$0xff]   ;;  %v555_v18 = vld [vmem:[%s796_s0 + $0x58] sm:$0xff]  }
   0x7   :  { %455 = vmatpush3.bf16.msra.mxu0 %v539_v2  ;;  %529 = vmatpush3.bf16.msra.mxu1 %v539_v2  ;;  %v556_v19 = vld [vmem:[%s796_s0 + $0x28] sm:$0xff]   ;;  %v557_v20 = vld [vmem:[%s796_s0 + $0x60] sm:$0xff]   ;;  %v558_v21 = vld [vmem:[%s796_s0 + $0x30] sm:$0xff]  }
   0x8   :  { %456 = vmatprep.subr.bf16.mxu0 %v559_v0  ;;  %522 = vmatprep.subr.bf16.mxu1 %v559_v0  ;;  %v689_v22 = vld [vmem:[%s797_s2] ss:$0 sm:$0xff] }
   0xb   :  { %457 = vmatpush3.bf16.msra.mxu0 %v540_v3  ;;  %530 = vmatpush3.bf16.msra.mxu1 %v540_v3 }
   0xc   :  { %458 = vmatprep.subr.bf16.mxu0 %v559_v0  ;;  %523 = vmatprep.subr.bf16.mxu1 %v559_v0 }
   0xf   :  { %459 = vmatpush3.bf16.msra.mxu0 %v541_v4  ;;  %531 = vmatpush3.bf16.msra.mxu1 %v541_v4 }
  0x10   :  { %460 = vmatprep.subr.bf16.mxu0 %v559_v0  ;;  %524 = vmatprep.subr.bf16.mxu1 %v559_v0 }
  0x13   :  { %461 = vmatpush3.bf16.msra.mxu0 %v542_v5  ;;  %532 = vmatpush3.bf16.msra.mxu1 %v542_v5 }
  0x14   :  { %462 = vmatprep.subr.bf16.mxu0 %v559_v0  ;;  %525 = vmatprep.subr.bf16.mxu1 %v559_v0 }
  0x17   :  { %463 = vmatpush3.bf16.msra.mxu0 %v543_v6  ;;  %533 = vmatpush3.bf16.msra.mxu1 %v543_v6 }
  0x18   :  { %464 = vmatprep.subr.bf16.mxu0 %v559_v0  ;;  %526 = vmatprep.subr.bf16.mxu1 %v559_v0 }
  0x1b   :  { %465 = vmatpush3.bf16.msra.mxu0 %v544_v7  ;;  %534 = vmatpush3.bf16.msra.mxu1 %v544_v7 }
  0x1c   :  { %466 = vmatprep.subr.bf16.mxu0 %v559_v0  ;;  %527 = vmatprep.subr.bf16.mxu1 %v559_v0 }
  0x1f   :  { %467 = vmatpush3.bf16.msra.mxu0 %v545_v8  ;;  %535 = vmatpush3.bf16.msra.mxu1 %v545_v8 }
  0x22   :  { %469 = vmatmul.mubr.bf16.vlgmr.msra.gmra.mrb[0].mxu0 %v546_v9  ;;  %497 = vmatmul.mubr.bf16.vlgmr.msra.gmra.mrb[0].mxu1 %v547_v10 }
  0x23   :  { %472 = vmatprep.mubr.msk.bf16.mxu0 %vm560_vm0, %v559_v0  ;;  %500 = vmatprep.mubr.msk.bf16.mxu1 %vm560_vm0, %v559_v0 }
  0x2a   :  { %473 = vmatmul.mubr.bf16.gmra.mrb[4].mxu0 %v548_v11  ;;  %501 = vmatmul.mubr.bf16.gmra.mrb[4].mxu1 %v549_v12 }
  0x2b   :  { %476 = vmatprep.mubr.msk.bf16.mxu0 %vm560_vm0, %v559_v0  ;;  %504 = vmatprep.mubr.msk.bf16.mxu1 %vm560_vm0, %v559_v0 }
  0x32   :  { %477 = vmatmul.mubr.bf16.gmra.mrb[8].mxu0 %v550_v13  ;;  %505 = vmatmul.mubr.bf16.gmra.mrb[8].mxu1 %v551_v14 }
  0x33   :  { %480 = vmatprep.mubr.msk.bf16.mxu0 %vm560_vm0, %v559_v0  ;;  %508 = vmatprep.mubr.msk.bf16.mxu1 %vm560_vm0, %v559_v0 }
  0x3a   :  { %481 = vmatmul.mubr.bf16.gmra.mrb[12].mxu0 %v552_v15  ;;  %509 = vmatmul.mubr.bf16.gmra.mrb[12].mxu1 %v553_v16 }
  0x3b   :  { %484 = vmatprep.mubr.msk.bf16.mxu0 %vm560_vm0, %v559_v0  ;;  %512 = vmatprep.mubr.msk.bf16.mxu1 %vm560_vm0, %v559_v0 }
  0x42   :  { %485 = vmatmul.mubr.bf16.gmra.mrb[16].mxu0 %v554_v17  ;;  %513 = vmatmul.mubr.bf16.gmra.mrb[16].mxu1 %v555_v18 }
  0x43   :  { %488 = vmatprep.mubr.msk.bf16.mxu0 %vm560_vm0, %v559_v0  ;;  %516 = vmatprep.mubr.msk.bf16.mxu1 %vm560_vm0, %v559_v0 }
  0x4a   :  { %489 = vmatmul.mubr.bf16.gmra.mrb[20].mxu0 %v556_v19  ;;  %517 = vmatmul.mubr.bf16.gmra.mrb[20].mxu1 %v557_v20 }
  0x4b   :  { %492 = vmatprep.mubr.msk.bf16.mxu0 %vm560_vm0, %v559_v0 }
  0x52   :  { %493 = vmatmul.mubr.bf16.gmra.mrb[24].mxu0 %v558_v21 }
  0xf5   :  { %v224_v23 = vpop.f32.mrb[0].mxu0  ;;  %v280_v24 = vpop.f32.mrb[0].mxu1 }
  0xf6   :  { %v225_v25 = vadd.f32 %v689_v22, %v224_v23  ;;  %v470_v26 = vpop.f32.mrb[1].mxu0  ;;  %v281_v27 = vadd.f32 %v689_v22, %v280_v24  ;;  %v498_v28 = vpop.f32.mrb[1].mxu1 }
  0xf7   :  { %v227_v29 = vpop.f32.mrb[2].mxu0  ;;  %v283_v30 = vpop.f32.mrb[2].mxu1 }
  0xf8   :  { %v327_v31 = vmul.f32 0.2, %v225_v25  ;;  %v228_v32 = vadd.f32 %v689_v22, %v227_v29  ;;  %v471_v33 = vpop.f32.mrb[3].mxu0  ;;  %v341_v34 = vmul.f32 0.2, %v281_v27  ;;  %v284_v35 = vadd.f32 %v689_v22, %v283_v30  ;;  %v499_v36 = vpop.f32.mrb[3].mxu1 }
  0xfa   :  { %v353_v37 = vmax.f32 %v225_v25, %v327_v31  ;;  %v328_v38 = vmul.f32 0.2, %v228_v32  ;;  %v367_v39 = vmax.f32 %v281_v27, %v341_v34  ;;  %v342_v40 = vmul.f32 0.2, %v284_v35 }
  0xfc   :  { %379 = vst [vmem:[%s798_s3] sm:$0xff] %v353_v37  ;;  %v354_v41 = vmax.f32 %v228_v32, %v328_v38  ;;  %393 = vst [vmem:[%s798_s3 + $0x70] sm:$0xff] %v367_v39  ;;  %v368_v42 = vmax.f32 %v284_v35, %v342_v40 }
  0xfd   :  { %v232_v43 = vpop.f32.mrb[4].mxu0  ;;  %v288_v44 = vpop.f32.mrb[4].mxu1 }
  0xfe   :  { %380 = vst [vmem:[%s798_s3 + $0x8] sm:$0xff] %v354_v41  ;;  %394 = vst [vmem:[%s798_s3 + $0x78] sm:$0xff] %v368_v42  ;;  %v233_v45 = vadd.f32 %v689_v22, %v232_v43  ;;  %v474_v46 = vpop.f32.mrb[5].mxu0  ;;  %v289_v47 = vadd.f32 %v689_v22, %v288_v44  ;;  %v502_v48 = vpop.f32.mrb[5].mxu1 }
  0xff   :  { %v235_v49 = vpop.f32.mrb[6].mxu0  ;;  %v291_v50 = vpop.f32.mrb[6].mxu1 }
 0x100   :  { %v329_v51 = vmul.f32 0.2, %v233_v45  ;;  %v236_v52 = vadd.f32 %v689_v22, %v235_v49  ;;  %v475_v53 = vpop.f32.mrb[7].mxu0  ;;  %v343_v54 = vmul.f32 0.2, %v289_v47  ;;  %v292_v55 = vadd.f32 %v689_v22, %v291_v50  ;;  %v503_v56 = vpop.f32.mrb[7].mxu1 }
 0x102   :  { %v355_v57 = vmax.f32 %v233_v45, %v329_v51  ;;  %v330_v58 = vmul.f32 0.2, %v236_v52  ;;  %v369_v59 = vmax.f32 %v289_v47, %v343_v54  ;;  %v344_v60 = vmul.f32 0.2, %v292_v55 }
 0x104   :  { %381 = vst [vmem:[%s798_s3 + $0x10] sm:$0xff] %v355_v57  ;;  %v356_v61 = vmax.f32 %v236_v52, %v330_v58  ;;  %395 = vst [vmem:[%s798_s3 + $0x80] sm:$0xff] %v369_v59  ;;  %v370_v62 = vmax.f32 %v292_v55, %v344_v60 }
 0x105   :  { %v240_v63 = vpop.f32.mrb[8].mxu0  ;;  %v296_v0 = vpop.f32.mrb[8].mxu1 }
 0x106   :  { %382 = vst [vmem:[%s798_s3 + $0x18] sm:$0xff] %v356_v61  ;;  %396 = vst [vmem:[%s798_s3 + $0x88] sm:$0xff] %v370_v62  ;;  %v241_v1 = vadd.f32 %v689_v22, %v240_v63  ;;  %v478_v2 = vpop.f32.mrb[9].mxu0  ;;  %v297_v3 = vadd.f32 %v689_v22, %v296_v0  ;;  %v506_v4 = vpop.f32.mrb[9].mxu1 }
 0x107   :  { %v243_v5 = vpop.f32.mrb[10].mxu0  ;;  %v299_v6 = vpop.f32.mrb[10].mxu1 }
 0x108   :  { %v331_v7 = vmul.f32 0.2, %v241_v1  ;;  %v244_v8 = vadd.f32 %v689_v22, %v243_v5  ;;  %v479_v9 = vpop.f32.mrb[11].mxu0  ;;  %v345_v10 = vmul.f32 0.2, %v297_v3  ;;  %v300_v11 = vadd.f32 %v689_v22, %v299_v6  ;;  %v507_v12 = vpop.f32.mrb[11].mxu1 }
 0x10a   :  { %v357_v13 = vmax.f32 %v241_v1, %v331_v7  ;;  %v332_v14 = vmul.f32 0.2, %v244_v8  ;;  %v371_v15 = vmax.f32 %v297_v3, %v345_v10  ;;  %v346_v16 = vmul.f32 0.2, %v300_v11 }
 0x10c   :  { %383 = vst [vmem:[%s798_s3 + $0x20] sm:$0xff] %v357_v13  ;;  %v358_v17 = vmax.f32 %v244_v8, %v332_v14  ;;  %397 = vst [vmem:[%s798_s3 + $0x90] sm:$0xff] %v371_v15  ;;  %v372_v18 = vmax.f32 %v300_v11, %v346_v16 }
 0x10d   :  { %v248_v19 = vpop.f32.mrb[12].mxu0  ;;  %v304_v20 = vpop.f32.mrb[12].mxu1 }
 0x10e   :  { %384 = vst [vmem:[%s798_s3 + $0x28] sm:$0xff] %v358_v17  ;;  %398 = vst [vmem:[%s798_s3 + $0x98] sm:$0xff] %v372_v18  ;;  %v249_v21 = vadd.f32 %v689_v22, %v248_v19  ;;  %v482_v23 = vpop.f32.mrb[13].mxu0  ;;  %v305_v24 = vadd.f32 %v689_v22, %v304_v20  ;;  %v510_v25 = vpop.f32.mrb[13].mxu1 }
 0x10f   :  { %v251_v26 = vpop.f32.mrb[14].mxu0  ;;  %v307_v27 = vpop.f32.mrb[14].mxu1 }
 0x110   :  { %v333_v28 = vmul.f32 0.2, %v249_v21  ;;  %v252_v29 = vadd.f32 %v689_v22, %v251_v26  ;;  %v483_v30 = vpop.f32.mrb[15].mxu0  ;;  %v347_v31 = vmul.f32 0.2, %v305_v24  ;;  %v308_v32 = vadd.f32 %v689_v22, %v307_v27  ;;  %v511_v33 = vpop.f32.mrb[15].mxu1 }
 0x112   :  { %v359_v34 = vmax.f32 %v249_v21, %v333_v28  ;;  %v334_v35 = vmul.f32 0.2, %v252_v29  ;;  %v373_v36 = vmax.f32 %v305_v24, %v347_v31  ;;  %v348_v37 = vmul.f32 0.2, %v308_v32 }
 0x114   :  { %385 = vst [vmem:[%s798_s3 + $0x30] sm:$0xff] %v359_v34  ;;  %v360_v38 = vmax.f32 %v252_v29, %v334_v35  ;;  %399 = vst [vmem:[%s798_s3 + $0xa0] sm:$0xff] %v373_v36  ;;  %v374_v39 = vmax.f32 %v308_v32, %v348_v37 }
 0x115   :  { %v256_v40 = vpop.f32.mrb[16].mxu0  ;;  %v312_v41 = vpop.f32.mrb[16].mxu1 }
 0x116   :  { %386 = vst [vmem:[%s798_s3 + $0x38] sm:$0xff] %v360_v38  ;;  %400 = vst [vmem:[%s798_s3 + $0xa8] sm:$0xff] %v374_v39  ;;  %v257_v42 = vadd.f32 %v689_v22, %v256_v40  ;;  %v486_v43 = vpop.f32.mrb[17].mxu0  ;;  %v313_v44 = vadd.f32 %v689_v22, %v312_v41  ;;  %v514_v45 = vpop.f32.mrb[17].mxu1 }
 0x117   :  { %v259_v46 = vpop.f32.mrb[18].mxu0  ;;  %v315_v47 = vpop.f32.mrb[18].mxu1 }
 0x118   :  { %v335_v48 = vmul.f32 0.2, %v257_v42  ;;  %v260_v49 = vadd.f32 %v689_v22, %v259_v46  ;;  %v487_v50 = vpop.f32.mrb[19].mxu0  ;;  %v349_v51 = vmul.f32 0.2, %v313_v44  ;;  %v316_v52 = vadd.f32 %v689_v22, %v315_v47  ;;  %v515_v53 = vpop.f32.mrb[19].mxu1 }
 0x11a   :  { %v361_v54 = vmax.f32 %v257_v42, %v335_v48  ;;  %v336_v55 = vmul.f32 0.2, %v260_v49  ;;  %v375_v56 = vmax.f32 %v313_v44, %v349_v51  ;;  %v350_v57 = vmul.f32 0.2, %v316_v52 }
 0x11c   :  { %387 = vst [vmem:[%s798_s3 + $0x40] sm:$0xff] %v361_v54  ;;  %v362_v58 = vmax.f32 %v260_v49, %v336_v55  ;;  %401 = vst [vmem:[%s798_s3 + $0xb0] sm:$0xff] %v375_v56  ;;  %v376_v59 = vmax.f32 %v316_v52, %v350_v57 }
 0x11d   :  { %v264_v60 = vpop.f32.mrb[20].mxu0  ;;  %v320_v61 = vpop.f32.mrb[20].mxu1 }
 0x11e   :  { %388 = vst [vmem:[%s798_s3 + $0x48] sm:$0xff] %v362_v58  ;;  %402 = vst [vmem:[%s798_s3 + $0xb8] sm:$0xff] %v376_v59  ;;  %v265_v62 = vadd.f32 %v689_v22, %v264_v60  ;;  %v490_v63 = vpop.f32.mrb[21].mxu0  ;;  %v321_v0 = vadd.f32 %v689_v22, %v320_v61  ;;  %v518_v1 = vpop.f32.mrb[21].mxu1 }
 0x11f   :  { %v267_v2 = vpop.f32.mrb[22].mxu0  ;;  %v323_v3 = vpop.f32.mrb[22].mxu1 }
 0x120   :  { %v337_v4 = vmul.f32 0.2, %v265_v62  ;;  %v268_v5 = vadd.f32 %v689_v22, %v267_v2  ;;  %v491_v6 = vpop.f32.mrb[23].mxu0  ;;  %v351_v7 = vmul.f32 0.2, %v321_v0  ;;  %v324_v8 = vadd.f32 %v689_v22, %v323_v3  ;;  %v519_v9 = vpop.f32.mrb[23].mxu1 }
 0x122   :  { %v363_v10 = vmax.f32 %v265_v62, %v337_v4  ;;  %v338_v11 = vmul.f32 0.2, %v268_v5  ;;  %v377_v12 = vmax.f32 %v321_v0, %v351_v7  ;;  %v352_v13 = vmul.f32 0.2, %v324_v8 }
 0x124   :  { %389 = vst [vmem:[%s798_s3 + $0x50] sm:$0xff] %v363_v10  ;;  %v364_v14 = vmax.f32 %v268_v5, %v338_v11  ;;  %403 = vst [vmem:[%s798_s3 + $0xc0] sm:$0xff] %v377_v12  ;;  %v378_v15 = vmax.f32 %v324_v8, %v352_v13 }
 0x125   :  { %v272_v16 = vpop.f32.mrb[24].mxu0 }
 0x126   :  { %390 = vst [vmem:[%s798_s3 + $0x58] sm:$0xff] %v364_v14  ;;  %404 = vst [vmem:[%s798_s3 + $0xc8] sm:$0xff] %v378_v15  ;;  %v273_v17 = vadd.f32 %v689_v22, %v272_v16  ;;  %v494_v18 = vpop.f32.mrb[25].mxu0 }
 0x127   :  { %v275_v19 = vpop.f32.mrb[26].mxu0 }
 0x128   :  { %v339_v20 = vmul.f32 0.2, %v273_v17  ;;  %v276_v21 = vadd.f32 %v689_v22, %v275_v19  ;;  %v495_v23 = vpop.f32.mrb[27].mxu0 }
 0x12a   :  { %v365_v24 = vmax.f32 %v273_v17, %v339_v20  ;;  %v340_v25 = vmul.f32 0.2, %v276_v21 }
 0x12c   :  { %391 = vst [vmem:[%s798_s3 + $0x60] sm:$0xff] %v365_v24  ;;  %v366_v26 = vmax.f32 %v276_v21, %v340_v25 }
 0x12e   :  { %392 = vst [vmem:[%s798_s3 + $0x68] sm:$0xff] %v366_v26 }

</bundles_post_ra>
